<compile_context>
chip_gen: v7x
topology: tpu7x:2x2x1
jax: 0.10.0
libtpu: 0.0.40
codegen_flags: <defaults>
</compile_context>

<pallas_src>
import jax
import jax.numpy as jnp
from jax.experimental import pallas as pl
from jax.experimental.pallas import tpu as pltpu


def logistic_kernel(x_ref, w_ref, b_ref, o_ref):
    # x_ref: (TILE_N, F) VMEM, w_ref: (1, F) VMEM, b_ref: (1, 1) SMEM scalar.
    x = x_ref[...]                                   # (TILE_N, F)
    w = w_ref[...]                                   # (1, F) -> broadcast over rows
    z = jnp.sum(x * w, axis=-1, keepdims=True)       # VPU mul + XLU row reduce
    z = z + b_ref[0, 0]                              # scalar bias from SMEM
    y = pl.reciprocal(1.0 + jnp.exp(-z), approx=True)  # sigmoid on EUP
    o_ref[...] = y.astype(o_ref.dtype)


def _round_up(n, m):
    return ((n + m - 1) // m) * m


def _choose_tile_n(n, f):
    # Target ~2 MiB x tile (memory-bound streaming), capped at 256 rows because
    # the (TILE_N, 1) result costs one vreg per 8 rows; floor 8 (sublane align).
    target = (2 * 1024 * 1024) // max(4 * f, 1)
    tile = min(256, max(8, target))
    tile -= tile % 8
    tile = max(8, tile)
    return min(tile, _round_up(n, 8))


def logistic_regression(x, w, b):
    """Pallas equivalent of torch.sigmoid(nn.Linear(F, 1)(x)).

    x: (N, F) float32, w: (1, F) float32 (PyTorch weight layout),
    b: (1, 1) float32  ->  (N, 1) float32
    """
    N, F = x.shape
    tile_n = _choose_tile_n(N, F)
    n_pad = _round_up(N, tile_n)
    if n_pad != N:
        x = jnp.pad(x, ((0, n_pad - N), (0, 0)))

    out = pl.pallas_call(
        logistic_kernel,
        out_shape=jax.ShapeDtypeStruct((n_pad, 1), jnp.float32),
        grid=(n_pad // tile_n,),
        in_specs=[
            pl.BlockSpec((tile_n, F), lambda i: (i, 0)),       # stream x rows
            pl.BlockSpec((1, F), lambda i: (0, 0)),            # weight resident
            pl.BlockSpec(memory_space=pltpu.MemorySpace.SMEM),  # scalar bias
        ],
        out_specs=pl.BlockSpec((tile_n, 1), lambda i: (i, 0)),
        compiler_params=pltpu.CompilerParams(
            dimension_semantics=("parallel",),   # v7x: shard rows across 2 TCs
        ),
    )(x, w, b)
    return out[:N]


if __name__ == "__main__":
    key = jax.random.PRNGKey(0)
    k_x, k_w, k_b, k_x2 = jax.random.split(key, 4)

    F = 32  # n_input_features

    # Deterministic "PyTorch-like" init: uniform(-1/sqrt(F), 1/sqrt(F))
    bound = 1.0 / jnp.sqrt(jnp.float32(F))
    w = jax.random.uniform(k_w, (1, F), jnp.float32, -bound, bound)
    b = jax.random.uniform(k_b, (1, 1), jnp.float32, -bound, bound)

    # Case 1: toy batch (single tile).
    N1 = 8
    x1 = jax.random.normal(k_x, (N1, F), jnp.float32)
    y1 = jax.block_until_ready(logistic_regression(x1, w, b))
    y1_ref = jax.nn.sigmoid(x1 @ w.T + b[0, 0])
    assert y1.shape == (N1, 1)
    assert jnp.allclose(y1, y1_ref, atol=2e-3, rtol=2e-3)

    # Case 2: ragged batch (multiple tiles + padded tail sliced off).
    N2 = 300
    x2 = jax.random.normal(k_x2, (N2, F), jnp.float32)
    y2 = jax.block_until_ready(logistic_regression(x2, w, b))
    y2_ref = jax.nn.sigmoid(x2 @ w.T + b[0, 0])
    assert y2.shape == (N2, 1)
    assert jnp.allclose(y2, y2_ref, atol=2e-3, rtol=2e-3)

    print("KERNEL_OK")
</pallas_src>

<mosaic_0001>
module attributes {stable_mosaic.version = 11 : i64} {
  func.func @logistic_kernel(%arg0: i32, %arg1: memref<8x32xf32, #tpu.memory_space<vmem>>, %arg2: memref<1x32xf32, #tpu.memory_space<vmem>>, %arg3: memref<1x1xf32, #tpu.memory_space<smem>>, %arg4: memref<8x1xf32, #tpu.memory_space<vmem>>) attributes {dimension_semantics = [#tpu.dimension_semantics<parallel>], iteration_bounds = array<i64: 1>, scalar_prefetch = 0 : i64, scratch_operands = 0 : i64, tpu.core_type = #tpu.core_type<tc>, window_params = [{transform_indices = @transform_0, window_bounds = array<i64: 8, 32>}, {pipeline_mode = #tpu.pipeline_mode<synchronous>, transform_indices = @transform_1, window_bounds = array<i64: 1, 32>}, {transform_indices = @transform_2, window_bounds = array<i64: 1, 1>}, {transform_indices = @transform_3, window_bounds = array<i64: 8, 1>}]} {
    %c0 = arith.constant 0 : index
    %c0_0 = arith.constant 0 : index
    %0 = vector.load %arg1[%c0, %c0_0] : memref<8x32xf32, #tpu.memory_space<vmem>>, vector<8x32xf32>
    %c0_1 = arith.constant 0 : index
    %c0_2 = arith.constant 0 : index
    %1 = vector.load %arg2[%c0_1, %c0_2] : memref<1x32xf32, #tpu.memory_space<vmem>>, vector<1x32xf32>
    %2 = vector.broadcast %1 : vector<1x32xf32> to vector<8x32xf32>
    %3 = arith.mulf %0, %2 : vector<8x32xf32>
    %cst = arith.constant dense<0.000000e+00> : vector<8xf32>
    %4 = vector.multi_reduction <add>, %3, %cst [1] : vector<8x32xf32> to vector<8xf32>
    %5 = vector.shape_cast %4 : vector<8xf32> to vector<8x1xf32>
    %c0_3 = arith.constant 0 : index
    %c0_4 = arith.constant 0 : index
    %6 = memref.load %arg3[%c0_3, %c0_4] : memref<1x1xf32, #tpu.memory_space<smem>>
    %7 = vector.broadcast %6 : f32 to vector<8x1xf32>
    %8 = arith.addf %5, %7 : vector<8x1xf32>
    %cst_5 = arith.constant 0.000000e+00 : f32
    %9 = vector.broadcast %cst_5 : f32 to vector<8x1xf32>
    %10 = arith.subf %9, %8 : vector<8x1xf32>
    %11 = math.exp %10 : vector<8x1xf32>
    %cst_6 = arith.constant 1.000000e+00 : f32
    %12 = vector.broadcast %cst_6 : f32 to vector<8x1xf32>
    %13 = arith.addf %12, %11 : vector<8x1xf32>
    %14 = tpu.reciprocal %13 {approx = true} : vector<8x1xf32> -> vector<8x1xf32>
    %c0_7 = arith.constant 0 : index
    %c0_8 = arith.constant 0 : index
    %15 = vector.load %arg4[%c0_7, %c0_8] : memref<8x1xf32, #tpu.memory_space<vmem>>, vector<8x1xf32>
    tpu.vector_store %arg4[%c0_7, %c0_8], %14 {strides = array<i32>} : memref<8x1xf32, #tpu.memory_space<vmem>>, vector<8x1xf32>,
    return
  }
  func.func @transform_0(%arg0: i32) -> (i32, i32) {
    %c0_i32 = arith.constant 0 : i32
    %c0_i32_0 = arith.constant 0 : i32
    return %arg0, %c0_i32 : i32, i32
  }
  func.func @transform_1(%arg0: i32) -> (i32, i32) {
    %c0_i32 = arith.constant 0 : i32
    %c0_i32_0 = arith.constant 0 : i32
    %c0_i32_1 = arith.constant 0 : i32
    return %c0_i32, %c0_i32_0 : i32, i32
  }
  func.func @transform_2(%arg0: i32) -> (i32, i32) {
    %c0_i32 = arith.constant 0 : i32
    %c0_i32_0 = arith.constant 0 : i32
    %c0_i32_1 = arith.constant 0 : i32
    return %c0_i32, %c0_i32_0 : i32, i32
  }
  func.func @transform_3(%arg0: i32) -> (i32, i32) {
    %c0_i32 = arith.constant 0 : i32
    %c0_i32_0 = arith.constant 0 : i32
    return %arg0, %c0_i32 : i32, i32
  }
}

</mosaic_0001>

<bundles_post_ra>
// kernel: tpu_custom_call.1
= control target key start
LH: loop header
LB: loop body
LE: loop exit
PB: predicated region body
PF: predicated region fallthrough
CT: control target
= control target key end

     0   :  { %9 = vsyncpa [#allocation4], 0  ;;  %s85_s12 = smov [#allocation3]   ;;  %s127_s0 = inlined_call_operand.hbm [shape: f32[8,32], index: 0, kind: input, shape index: {}]   ;;  %s128_s1 = inlined_call_operand.vmem [shape: f32[1,32], index: 1, kind: input, shape index: {}]   ;;  %s129_s2 = inlined_call_operand.<no memory space> [shape: f32[1,1], index: 2, kind: input, shape index: {}]   ;;  %s130_s3 = inlined_call_operand.vmem [shape: f32[8,1], index: 3, kind: output, shape index: {}]  }
   0x1   :  { %s16_s13 = sshll.u32 %s85_s12, 4  ;;  %s61_s16 = scalar_lea.hbm %s127_s0, 128  ;;  %s17_s13 = int_to_ptr.vmem [resolvable:$true] %s16_s13 }
   0x2   :  { %p62_p0 = scmp.ne.s32.totalorder %s127_s0, %s61_s16  ;;  %p65_p1 = scmp.lt.u32.totalorder %s61_s16, %s127_s0 }
   0x4   :  { %p67_p2 = pnand %p65_p1, %p62_p0 }
   0x6   :  { %70 = shalt.err (!%p67_p2)
}
   0x7   :  { %s71_s21 = scalar_lea.vmem %s17_s13, 128  ;;  %p76_p4 = scmp.lt.s32.totalorder %s17_s13, %s17_s13 }
   0x8   :  { %p72_p3 = scmp.ne.s32.totalorder %s17_s13, %s71_s21  ;;  %p77_p5 = scmp.lt.s32.totalorder %s71_s21, %s71_s21 }
   0xa   :  { %p78_p6 = por %p77_p5, %p76_p4 }
   0xc   :  { %p79_p7 = pnand %p78_p6, %p72_p3 }
   0xe   :  { %82 = shalt.err (!%p79_p7)
}
   0xf   :  { %19 = dma.hbm_to_vmem [thread:$0]  %s127_s0, 128, %s17_s13, [#allocation4]  }
  0x10   :  { %83 = dma.done.wait [#allocation4], 128  }
  0x11   :  { %84 = vsyncadd [#allocation4], 4294967168  ;;  %v27_v0 = vld [vmem:[#allocation3] sm:$0xff]  ;;  %vm36_vm0 = vcmask 261120   ;;  %v41_v4 = vstv %s129_s2  ;;  %vm48_vm1 = vcmask 7168  }
  0x12   :  { %v55_v1 = vld [vmem:[%s128_s1] ss:$0 sm:$0xff] }
  0x13   :  { %v35_v2 = vmul.f32 %v55_v1, %v27_v0 }
  0x15   :  { %v37_v3 = vsel %vm36_vm0, %v35_v2, 0.0 }
  0x16   :  { %38 = vadd.xlane.f32.xlu0 %v37_v3 }
  0xa3   :  { %v39_v5 = vpop.xlane.xlu0 %38 }
  0xa4   :  { %v42_v6 = vadd.f32 %v41_v4, %v39_v5 }
  0xa6   :  { %v43_v7 = vsub.f32 0.0, %v42_v6 }
  0xa8   :  { %v44_v8 = vmul.f32 1.442695, %v43_v7 }
  0xaa   :  { %57 = vpow2.f32 %v44_v8 }
  0xb4   :  { %v58_v9 = vpop.eup %57 }
  0xb5   :  { %v46_v10 = vadd.f32 1.0, %v58_v9 }
  0xb7   :  { %59 = vrcp.f32 %v46_v10 }
  0xc1   :  { %v60_v11 = vpop.eup %59 }
  0xc2   :  { %49 = vst.msk [vmem:[%s130_s3] sm:$0xff] %vm48_vm1, %v60_v11 }
  0xc3   :  { %54 = vsyncpa [#allocation4], 1 }

</bundles_post_ra>
